<compile_context>
chip_gen: v6e
topology: v6e:2x2x1
jax: 0.10.0
libtpu: 0.0.40
codegen_flags: <defaults>
</compile_context>

<pallas_src>
import functools

import jax
import jax.numpy as jnp
from jax.experimental import pallas as pl
from jax.experimental.pallas import tpu as pltpu

C_OUT = 16
K = 3


def _round_up(x, m):
    return (x + m - 1) // m * m


def _conv_kernel(x_ref, w_ref, b_ref, o_ref, *, in_w):
    # x_ref: (nb, HW_pad)     nb flat images (row-major, zero-padded, lane-dense)
    # w_ref: (K*K, C_OUT, 1)  conv weights, tap-major
    # b_ref: (C_OUT, 1)       bias
    # o_ref: (nb, C_OUT, L)   L = Ho * W  ("input-strided" output slab)
    nb, c_out, out_len = o_ref.shape
    x = x_ref[...]                                    # (nb, HW_pad)

    # Bias folded into the accumulator init.
    acc = jnp.broadcast_to(b_ref[...][None, :, :], (nb, c_out, out_len))

    # 3x3 valid conv = 9 shifted multiply-accumulates on dense flat slabs (VPU).
    for t in range(K * K):
        dy, dx = divmod(t, K)
        off = dy * in_w + dx                          # static lane offset
        patch = x[:, off:off + out_len]               # (nb, L) contiguous slice
        wtap = w_ref[t]                               # (C_OUT, 1), no lane shuffle
        acc = acc + wtap[None, :, :] * patch[:, None, :]

    o_ref[...] = acc.astype(o_ref.dtype)


def conv_fwd(x_nchw, weight, bias, *, images_per_block=None):
    """x_nchw: (N, 1, H, W) f32; weight: (16, 1, 3, 3); bias: (16,)."""
    n, c_in, h, w = x_nchw.shape
    assert c_in == 1
    ho, wo = h - (K - 1), w - (K - 1)
    out_len = ho * w                      # input-strided flattened output length
    hw = h * w
    # Pad flat images so every shifted tap slice of length out_len is in bounds,
    # rounded to a 128-lane multiple for unmasked vector loads.
    max_off = (K - 1) * w + (K - 1)
    hw_pad = _round_up(hw + max_off, 128)

    if images_per_block is None:
        # Fuse the batch but keep >=2 grid steps (v7x has 2 TensorCores).
        images_per_block = max(1, -(-n // 2))
    nb = min(images_per_block, n)
    nblk = -(-n // nb)
    n_pad = nblk * nb

    x_flat = x_nchw.reshape(n, hw).astype(jnp.float32)
    x_flat = jnp.pad(x_flat, ((0, n_pad - n), (0, hw_pad - hw)))
    x_blk = x_flat.reshape(nblk, nb, hw_pad)

    # Tap-major weights: w_taps[t, c, 0] == weight[c, 0, t // K, t % K].
    w_taps = jnp.transpose(weight[:, 0].reshape(C_OUT, K * K), (1, 0))
    w_taps = w_taps.reshape(K * K, C_OUT, 1).astype(jnp.float32)
    b_col = bias.reshape(C_OUT, 1).astype(jnp.float32)

    out = pl.pallas_call(
        functools.partial(_conv_kernel, in_w=w),
        out_shape=jax.ShapeDtypeStruct((nblk, nb, C_OUT, out_len), jnp.float32),
        grid_spec=pltpu.PrefetchScalarGridSpec(
            num_scalar_prefetch=0,
            grid=(nblk,),
            in_specs=[
                pl.BlockSpec((pl.Squeezed(), nb, hw_pad), lambda i: (i, 0, 0)),
                pl.BlockSpec((K * K, C_OUT, 1), lambda i: (0, 0, 0)),
                pl.BlockSpec((C_OUT, 1), lambda i: (0, 0)),
            ],
            out_specs=pl.BlockSpec((pl.Squeezed(), nb, C_OUT, out_len),
                                   lambda i: (i, 0, 0, 0)),
        ),
        compiler_params=pltpu.CompilerParams(
            dimension_semantics=("parallel",)),
        # Blocks here are KB-scale; no need to raise vmem_limit_bytes.  If this
        # is ever scaled to large images, tile output rows with a 2-row halo and
        # set vmem_limit_bytes so double-buffered blocks fit v7x's 64 MiB VMEM.
    )(x_blk, w_taps, b_col)

    # Undo the padded / input-strided layout (layout plumbing outside the kernel).
    out = out.reshape(n_pad, C_OUT, ho, w)[:n, :, :, :wo]
    return out


def _reference(x_nchw, weight, bias):
    # Pure-JAX reference conv for correctness check.
    out = jax.lax.conv_general_dilated(
        x_nchw, weight, window_strides=(1, 1), padding="VALID",
        dimension_numbers=("NCHW", "OIHW", "NCHW"))
    return out + bias[None, :, None, None]


if __name__ == "__main__":
    key = jax.random.PRNGKey(0)
    kx, kw, kb = jax.random.split(key, 3)

    # Small shapes consistent with the module: N=2, C_in=1, H=W=16.
    x = jax.random.normal(kx, (2, 1, 16, 16), dtype=jnp.float32)
    weight = jax.random.normal(kw, (C_OUT, 1, K, K), dtype=jnp.float32) * 0.1
    bias = jax.random.normal(kb, (C_OUT,), dtype=jnp.float32) * 0.1

    out = conv_fwd(x, weight, bias)
    out = jax.block_until_ready(out)

    ref = _reference(x, weight, bias)
    assert out.shape == (2, C_OUT, 14, 14), out.shape
    assert jnp.allclose(out, ref, atol=1e-5, rtol=1e-5)

    print("KERNEL_OK")
</pallas_src>

<mosaic_0001>
module attributes {stable_mosaic.version = 11 : i64} {
  func.func @_conv_kernel(%arg0: i32, %arg1: memref<1x1x384xf32, #tpu.memory_space<vmem>>, %arg2: memref<9x16x1xf32, #tpu.memory_space<vmem>>, %arg3: memref<16x1xf32, #tpu.memory_space<vmem>>, %arg4: memref<1x1x16x224xf32, #tpu.memory_space<vmem>>) attributes {dimension_semantics = [#tpu.dimension_semantics<parallel>], iteration_bounds = array<i64: 2>, scalar_prefetch = 0 : i64, scratch_operands = 0 : i64, tpu.core_type = #tpu.core_type<tc>, window_params = [{transform_indices = @transform_0, window_bounds = array<i64: 1, 1, 384>}, {pipeline_mode = #tpu.pipeline_mode<synchronous>, transform_indices = @transform_1, window_bounds = array<i64: 9, 16, 1>}, {pipeline_mode = #tpu.pipeline_mode<synchronous>, transform_indices = @transform_2, window_bounds = array<i64: 16, 1>}, {transform_indices = @transform_3, window_bounds = array<i64: 1, 1, 16, 224>}]} {
    %c0 = arith.constant 0 : index
    %c0_0 = arith.constant 0 : index
    %c0_1 = arith.constant 0 : index
    %0 = vector.load %arg1[%c0, %c0_0, %c0_1] : memref<1x1x384xf32, #tpu.memory_space<vmem>>, vector<1x1x384xf32>
    %1 = vector.shape_cast %0 : vector<1x1x384xf32> to vector<1x384xf32>
    %c0_2 = arith.constant 0 : index
    %c0_3 = arith.constant 0 : index
    %2 = vector.load %arg3[%c0_2, %c0_3] : memref<16x1xf32, #tpu.memory_space<vmem>>, vector<16x1xf32>
    %3 = vector.shape_cast %2 : vector<16x1xf32> to vector<1x16x1xf32>
    %4 = vector.shape_cast %3 : vector<1x16x1xf32> to vector<1x16x1xf32>
    %5 = vector.broadcast %4 : vector<1x16x1xf32> to vector<1x16x224xf32>
    %6 = vector.extract_strided_slice %1 {offsets = [0, 0], sizes = [1, 224], strides = [1, 1]} : vector<1x384xf32> to vector<1x224xf32>
    %c0_4 = arith.constant 0 : index
    %c0_5 = arith.constant 0 : index
    %c0_6 = arith.constant 0 : index
    %7 = vector.load %arg2[%c0_4, %c0_5, %c0_6] : memref<9x16x1xf32, #tpu.memory_space<vmem>>, vector<1x16x1xf32>
    %8 = vector.shape_cast %7 : vector<1x16x1xf32> to vector<16x1xf32>
    %9 = vector.shape_cast %8 : vector<16x1xf32> to vector<1x16x1xf32>
    %10 = vector.shape_cast %6 : vector<1x224xf32> to vector<1x1x224xf32>
    %11 = vector.broadcast %9 : vector<1x16x1xf32> to vector<1x16x224xf32>
    %12 = vector.broadcast %10 : vector<1x1x224xf32> to vector<1x16x224xf32>
    %13 = arith.mulf %11, %12 : vector<1x16x224xf32>
    %14 = arith.addf %5, %13 : vector<1x16x224xf32>
    %15 = vector.extract_strided_slice %1 {offsets = [0, 1], sizes = [1, 224], strides = [1, 1]} : vector<1x384xf32> to vector<1x224xf32>
    %c1 = arith.constant 1 : index
    %c0_7 = arith.constant 0 : index
    %c0_8 = arith.constant 0 : index
    %16 = vector.load %arg2[%c1, %c0_7, %c0_8] : memref<9x16x1xf32, #tpu.memory_space<vmem>>, vector<1x16x1xf32>
    %17 = vector.shape_cast %16 : vector<1x16x1xf32> to vector<16x1xf32>
    %18 = vector.shape_cast %17 : vector<16x1xf32> to vector<1x16x1xf32>
    %19 = vector.shape_cast %15 : vector<1x224xf32> to vector<1x1x224xf32>
    %20 = vector.broadcast %18 : vector<1x16x1xf32> to vector<1x16x224xf32>
    %21 = vector.broadcast %19 : vector<1x1x224xf32> to vector<1x16x224xf32>
    %22 = arith.mulf %20, %21 : vector<1x16x224xf32>
    %23 = arith.addf %14, %22 : vector<1x16x224xf32>
    %24 = vector.extract_strided_slice %1 {offsets = [0, 2], sizes = [1, 224], strides = [1, 1]} : vector<1x384xf32> to vector<1x224xf32>
    %c2 = arith.constant 2 : index
    %c0_9 = arith.constant 0 : index
    %c0_10 = arith.constant 0 : index
    %25 = vector.load %arg2[%c2, %c0_9, %c0_10] : memref<9x16x1xf32, #tpu.memory_space<vmem>>, vector<1x16x1xf32>
    %26 = vector.shape_cast %25 : vector<1x16x1xf32> to vector<16x1xf32>
    %27 = vector.shape_cast %26 : vector<16x1xf32> to vector<1x16x1xf32>
    %28 = vector.shape_cast %24 : vector<1x224xf32> to vector<1x1x224xf32>
    %29 = vector.broadcast %27 : vector<1x16x1xf32> to vector<1x16x224xf32>
    %30 = vector.broadcast %28 : vector<1x1x224xf32> to vector<1x16x224xf32>
    %31 = arith.mulf %29, %30 : vector<1x16x224xf32>
    %32 = arith.addf %23, %31 : vector<1x16x224xf32>
    %33 = vector.extract_strided_slice %1 {offsets = [0, 16], sizes = [1, 224], strides = [1, 1]} : vector<1x384xf32> to vector<1x224xf32>
    %c3 = arith.constant 3 : index
    %c0_11 = arith.constant 0 : index
    %c0_12 = arith.constant 0 : index
    %34 = vector.load %arg2[%c3, %c0_11, %c0_12] : memref<9x16x1xf32, #tpu.memory_space<vmem>>, vector<1x16x1xf32>
    %35 = vector.shape_cast %34 : vector<1x16x1xf32> to vector<16x1xf32>
    %36 = vector.shape_cast %35 : vector<16x1xf32> to vector<1x16x1xf32>
    %37 = vector.shape_cast %33 : vector<1x224xf32> to vector<1x1x224xf32>
    %38 = vector.broadcast %36 : vector<1x16x1xf32> to vector<1x16x224xf32>
    %39 = vector.broadcast %37 : vector<1x1x224xf32> to vector<1x16x224xf32>
    %40 = arith.mulf %38, %39 : vector<1x16x224xf32>
    %41 = arith.addf %32, %40 : vector<1x16x224xf32>
    %42 = vector.extract_strided_slice %1 {offsets = [0, 17], sizes = [1, 224], strides = [1, 1]} : vector<1x384xf32> to vector<1x224xf32>
    %c4 = arith.constant 4 : index
    %c0_13 = arith.constant 0 : index
    %c0_14 = arith.constant 0 : index
    %43 = vector.load %arg2[%c4, %c0_13, %c0_14] : memref<9x16x1xf32, #tpu.memory_space<vmem>>, vector<1x16x1xf32>
    %44 = vector.shape_cast %43 : vector<1x16x1xf32> to vector<16x1xf32>
    %45 = vector.shape_cast %44 : vector<16x1xf32> to vector<1x16x1xf32>
    %46 = vector.shape_cast %42 : vector<1x224xf32> to vector<1x1x224xf32>
    %47 = vector.broadcast %45 : vector<1x16x1xf32> to vector<1x16x224xf32>
    %48 = vector.broadcast %46 : vector<1x1x224xf32> to vector<1x16x224xf32>
    %49 = arith.mulf %47, %48 : vector<1x16x224xf32>
    %50 = arith.addf %41, %49 : vector<1x16x224xf32>
    %51 = vector.extract_strided_slice %1 {offsets = [0, 18], sizes = [1, 224], strides = [1, 1]} : vector<1x384xf32> to vector<1x224xf32>
    %c5 = arith.constant 5 : index
    %c0_15 = arith.constant 0 : index
    %c0_16 = arith.constant 0 : index
    %52 = vector.load %arg2[%c5, %c0_15, %c0_16] : memref<9x16x1xf32, #tpu.memory_space<vmem>>, vector<1x16x1xf32>
    %53 = vector.shape_cast %52 : vector<1x16x1xf32> to vector<16x1xf32>
    %54 = vector.shape_cast %53 : vector<16x1xf32> to vector<1x16x1xf32>
    %55 = vector.shape_cast %51 : vector<1x224xf32> to vector<1x1x224xf32>
    %56 = vector.broadcast %54 : vector<1x16x1xf32> to vector<1x16x224xf32>
    %57 = vector.broadcast %55 : vector<1x1x224xf32> to vector<1x16x224xf32>
    %58 = arith.mulf %56, %57 : vector<1x16x224xf32>
    %59 = arith.addf %50, %58 : vector<1x16x224xf32>
    %60 = vector.extract_strided_slice %1 {offsets = [0, 32], sizes = [1, 224], strides = [1, 1]} : vector<1x384xf32> to vector<1x224xf32>
    %c6 = arith.constant 6 : index
    %c0_17 = arith.constant 0 : index
    %c0_18 = arith.constant 0 : index
    %61 = vector.load %arg2[%c6, %c0_17, %c0_18] : memref<9x16x1xf32, #tpu.memory_space<vmem>>, vector<1x16x1xf32>
    %62 = vector.shape_cast %61 : vector<1x16x1xf32> to vector<16x1xf32>
    %63 = vector.shape_cast %62 : vector<16x1xf32> to vector<1x16x1xf32>
    %64 = vector.shape_cast %60 : vector<1x224xf32> to vector<1x1x224xf32>
    %65 = vector.broadcast %63 : vector<1x16x1xf32> to vector<1x16x224xf32>
    %66 = vector.broadcast %64 : vector<1x1x224xf32> to vector<1x16x224xf32>
    %67 = arith.mulf %65, %66 : vector<1x16x224xf32>
    %68 = arith.addf %59, %67 : vector<1x16x224xf32>
    %69 = vector.extract_strided_slice %1 {offsets = [0, 33], sizes = [1, 224], strides = [1, 1]} : vector<1x384xf32> to vector<1x224xf32>
    %c7 = arith.constant 7 : index
    %c0_19 = arith.constant 0 : index
    %c0_20 = arith.constant 0 : index
    %70 = vector.load %arg2[%c7, %c0_19, %c0_20] : memref<9x16x1xf32, #tpu.memory_space<vmem>>, vector<1x16x1xf32>
    %71 = vector.shape_cast %70 : vector<1x16x1xf32> to vector<16x1xf32>
    %72 = vector.shape_cast %71 : vector<16x1xf32> to vector<1x16x1xf32>
    %73 = vector.shape_cast %69 : vector<1x224xf32> to vector<1x1x224xf32>
    %74 = vector.broadcast %72 : vector<1x16x1xf32> to vector<1x16x224xf32>
    %75 = vector.broadcast %73 : vector<1x1x224xf32> to vector<1x16x224xf32>
    %76 = arith.mulf %74, %75 : vector<1x16x224xf32>
    %77 = arith.addf %68, %76 : vector<1x16x224xf32>
    %78 = vector.extract_strided_slice %1 {offsets = [0, 34], sizes = [1, 224], strides = [1, 1]} : vector<1x384xf32> to vector<1x224xf32>
    %c8 = arith.constant 8 : index
    %c0_21 = arith.constant 0 : index
    %c0_22 = arith.constant 0 : index
    %79 = vector.load %arg2[%c8, %c0_21, %c0_22] : memref<9x16x1xf32, #tpu.memory_space<vmem>>, vector<1x16x1xf32>
    %80 = vector.shape_cast %79 : vector<1x16x1xf32> to vector<16x1xf32>
    %81 = vector.shape_cast %80 : vector<16x1xf32> to vector<1x16x1xf32>
    %82 = vector.shape_cast %78 : vector<1x224xf32> to vector<1x1x224xf32>
    %83 = vector.broadcast %81 : vector<1x16x1xf32> to vector<1x16x224xf32>
    %84 = vector.broadcast %82 : vector<1x1x224xf32> to vector<1x16x224xf32>
    %85 = arith.mulf %83, %84 : vector<1x16x224xf32>
    %86 = arith.addf %77, %85 : vector<1x16x224xf32>
    %c0_23 = arith.constant 0 : index
    %c0_24 = arith.constant 0 : index
    %c0_25 = arith.constant 0 : index
    %c0_26 = arith.constant 0 : index
    %87 = vector.load %arg4[%c0_23, %c0_24, %c0_25, %c0_26] : memref<1x1x16x224xf32, #tpu.memory_space<vmem>>, vector<1x1x16x224xf32>
    %88 = vector.shape_cast %87 : vector<1x1x16x224xf32> to vector<1x16x224xf32>
    %89 = vector.shape_cast %86 : vector<1x16x224xf32> to vector<1x1x16x224xf32>
    tpu.vector_store %arg4[%c0_23, %c0_24, %c0_25, %c0_26], %89 {strides = array<i32>} : memref<1x1x16x224xf32, #tpu.memory_space<vmem>>, vector<1x1x16x224xf32>,
    return
  }
  func.func @transform_0(%arg0: i32) -> (i32, i32, i32) {
    %c0_i32 = arith.constant 0 : i32
    %c0_i32_0 = arith.constant 0 : i32
    %c0_i32_1 = arith.constant 0 : i32
    return %arg0, %c0_i32, %c0_i32_0 : i32, i32, i32
  }
  func.func @transform_1(%arg0: i32) -> (i32, i32, i32) {
    %c0_i32 = arith.constant 0 : i32
    %c0_i32_0 = arith.constant 0 : i32
    %c0_i32_1 = arith.constant 0 : i32
    %c0_i32_2 = arith.constant 0 : i32
    return %c0_i32, %c0_i32_0, %c0_i32_1 : i32, i32, i32
  }
  func.func @transform_2(%arg0: i32) -> (i32, i32) {
    %c0_i32 = arith.constant 0 : i32
    %c0_i32_0 = arith.constant 0 : i32
    %c0_i32_1 = arith.constant 0 : i32
    return %c0_i32, %c0_i32_0 : i32, i32
  }
  func.func @transform_3(%arg0: i32) -> (i32, i32, i32, i32) {
    %c0_i32 = arith.constant 0 : i32
    %c0_i32_0 = arith.constant 0 : i32
    %c0_i32_1 = arith.constant 0 : i32
    %c0_i32_2 = arith.constant 0 : i32
    return %arg0, %c0_i32, %c0_i32_0, %c0_i32_1 : i32, i32, i32, i32
  }
}

</mosaic_0001>

<bundles_post_ra>
// kernel: tpu_custom_call.1
= control target key start
LH: loop header
LB: loop body
LE: loop exit
PB: predicated region body
PF: predicated region fallthrough
CT: control target
= control target key end

     0   :  { %8 = vsyncpa [#allocation3], 0  ;;  %s1063_s0 = inlined_call_operand.vmem [shape: f32[2,1,384], index: 0, kind: input, shape index: {}]   ;;  %s1064_s1 = inlined_call_operand.vmem [shape: f32[9,16,1], index: 1, kind: input, shape index: {}]   ;;  %s1065_s2 = inlined_call_operand.vmem [shape: f32[16,1], index: 2, kind: input, shape index: {}]   ;;  %s1066_s3 = inlined_call_operand.hbm [shape: f32[2,1,16,224], index: 3, kind: output, shape index: {}]  }
   0x1   :  { %10 = vsyncpa [#allocation3 + $0x1], 0  ;;  %s809_s12 = smov 0   ;;  %s811_s13 = smov 0  }
   0x2   :  { %s813_s14 = smov 0   ;;  %s815_s15 = smov 0  }
   0x3 LB: > { %s830_s16 = sadd.s32 4294967295, %s775_s15   ;;  %s635_s17 = sadd.s32 4294967294, %s775_s15   ;;  %s775_s15 = sphi %s815_s15, %s1072_s15   ;;  %s771_s14 = sphi %s813_s14, %s1071_s14   ;;  %s767_s13 = sphi %s811_s13, %s1070_s13   ;;  %s763_s12 = sphi %s809_s12, %s1069_s12  }
   0x4   : > { %s834_s18 = sadd.s32 1, %s775_s15   ;;  %s91_s19 = sadd.s32 1, %s771_s14 }
   0x5   : > { %s88_s20 = ssub.s32 %s775_s15, %s834_s18  ;;  %p101_p0 = scmp.ne.s32.totalorder %s771_s14, %s767_s13 }
   0x6   : > { %p89_p1 = scmp.eq.s32.totalorder %s88_s20, 0  ;;  %p102_p2 = scmp.eq.s32.totalorder %s830_s16, 1 }
   0x7   : > { %p107_p3 = scmp.ne.s32.totalorder %s767_s13, %s763_s12  ;;  %p108_p4 = scmp.eq.s32.totalorder %s635_s17, 1 }
   0x8   : > { %s845_s21 = scalar_select %p89_p1, %s771_s14, %s91_s19  }
   0x9   : > { %p847_p5 = por %p102_p2, %p101_p0  ;;  %p851_p6 = por %p108_p4, %p107_p3 }
   0xa   : > { %p638_p7 = scmp.ge.s32.totalorder %s775_s15, 1  ;;  %p139_p8 = scmp.lt.s32.totalorder %s775_s15, 3 }
   0xc   : > { %p140_p9 = pnand %p638_p7, %p139_p8 }
   0xd   : > { %p162_p10 = scmp.lt.s32.totalorder (!%p140_p9), %s830_s16, 1  ;;  %s778_s6 = smov (!%p140_p9), 127  }
   0xe   : > { %143 = sbr.rel (%p140_p9) target bundleno = 351 (0x15f), region = 32  ;;  %s779_s7 = smov (!%p140_p9), 126  }
   0xf   : > { %s780_s8 = smov (!%p140_p9), 112   ;;  %s781_s9 = smov (!%p140_p9), 111  }
  0x10   : > { %s782_s10 = smov (!%p140_p9), 110   ;;  %s783_s11 = smov (!%p140_p9), 96  }
  0x11   : > { %s784_s17 = smov (!%p140_p9), 95   ;;  %s785_s19 = smov (!%p140_p9), 94  }
  0x12   : > { %s159_s20 = sand.u32 (!%p140_p9), 1, %s767_s13   ;;  %s661_s27 = sshll.u32 (!%p140_p9), %s830_s16, 9 }
  0x13   : > { %v179_v0 = vld [vmem:[%s1064_s1] sm:$0xff]  ;;  %v777_v2 = vmov 0   ;;  %v640_v3 = vld [vmem:[%s1064_s1 + $0x10] sm:$0xff]  ;;  %v168_v4 = vld [vmem:[%s1065_s2 + $0x8] sm:$0xff]  ;;  %s163_s28 = scalar_select %p162_p10, %s830_s16, 1  ;;  %v192_v21 = vlaneseq  ;;  %vm239_vm0 = vcmask 1039360  }
  0x14   : > { %v167_v1 = vld [vmem:[%s1065_s2] sm:$0xff]  ;;  %714 = vset.pattern.permute.xlu1 %v777_v2  ;;  %713 = vset.pattern.permute.xlu0 %v777_v2  ;;  %v641_v6 = vld [vmem:[%s1064_s1 + $0x18] sm:$0xff]  ;;  %v644_v7 = vld [vmem:[%s1064_s1 + $0x30] sm:$0xff]  ;;  %vm279_vm1 = vcmask 1031168   ;;  %vm319_vm2 = vcmask 916480   ;;  %vm359_vm3 = vcmask 908288  }
  0x15   : > { %183 = vperm.xlu1 %714, %v179_v0   ;;  %171 = vperm.xlu0 %713, %v167_v1   ;;  %v642_v5 = vld [vmem:[%s1064_s1 + $0x20] sm:$0xff]  ;;  %v643_v8 = vld [vmem:[%s1064_s1 + $0x28] sm:$0xff]  ;;  %v645_v10 = vld [vmem:[%s1064_s1 + $0x38] sm:$0xff]  ;;  %s662_s29 = smul.u32 3, %s163_s28  ;;  %v919_v22 = vshrl.u32 %v192_v21, 7  ;;  %vm399_vm4 = vcmask 900096  }
  0x16   : > { %v646_v9 = vld [vmem:[%s1064_s1 + $0x40] sm:$0xff]  ;;  %v648_v11 = vld [vmem:[%s1064_s1 + $0x50] sm:$0xff]  ;;  %v647_v12 = vld [vmem:[%s1064_s1 + $0x48] sm:$0xff]  ;;  %vm439_vm5 = vcmask 785408   ;;  %vm492_vm6 = vcmask 777216   ;;  %vm542_vm7 = vcmask 769024  }
  0x17   : > { %v650_v13 = vld [vmem:[%s1064_s1 + $0x60] sm:$0xff]  ;;  %v649_v14 = vld [vmem:[%s1064_s1 + $0x58] sm:$0xff]  ;;  %v652_v15 = vld [vmem:[%s1064_s1 + $0x70] sm:$0xff]  ;;  %s165_s5 = scalar_lea.vmem %s1063_s0, %s662_s29  ;;  %v194_v23 = vsub.s32 0, %v919_v22  ;;  %v198_v24 = vsub.s32 1, %v919_v22  ;;  %s639_s24 = sshll.u32 %s159_s20, 5 }
  0x18   : > { %v651_v16 = vld [vmem:[%s1064_s1 + $0x68] sm:$0xff]  ;;  %v654_v17 = vld [vmem:[%s1064_s1 + $0x80] sm:$0xff]  ;;  %v653_v18 = vld [vmem:[%s1064_s1 + $0x78] sm:$0xff]  ;;  %s161_s25 = scalar_lea.vmem [#allocation2], %s639_s24  ;;  %s1018_s29 = scalar_lea.hbm %s1066_s3, %s661_s27 }
  0x19   : > { %215 = vperm.xlu1 %714, %v640_v3   ;;  %176 = vperm.xlu0 %713, %v168_v4   ;;  %v180_v19 = vld [vmem:[%s1064_s1 + $0x8] sm:$0xff]  ;;  %v926_v25 = vld [vmem:[%s165_s5] sm:$0x7]  ;;  %s573_s26 = sshll.u32 %s161_s25, 4  ;;  %s1023_s30 = scalar_lea.sflag [#allocation3], %s159_s20  ;;  %s1011_s26 = int_to_ptr.vmem [resolvable:$true] %s573_s26 }
  0x1a   : > { %v655_v20 = vld [vmem:[%s1064_s1 + $0x88] sm:$0xff]  ;;  %v929_v26 = vrot.slane %v926_v25, %v194_v23  ;;  %v932_v27 = vrot.slane %v926_v25, %v198_v24  ;;  %s715_s4 = scalar_lea.vmem %s1011_s26, 512  ;;  %s786_s5 = smov [#allocation2]  }
  0x1b   : > { %p716_p11 = scmp.ne.s32.totalorder %s1011_s26, %s715_s4 }
  0x1d   : > { %255 = vperm.xlu1 %714, %v642_v5   ;;  %220 = vperm.xlu0 %713, %v641_v6   ;;  %p717_p12 = pnand %p716_p11, %p847_p5 }
  0x1f   : > { %p718_p13 = pneg %p717_p12 }
  0x21   : > { %295 = vperm.xlu1 %714, %v644_v7   ;;  %260 = vperm.xlu0 %713, %v643_v8  }
  0x25   : > { %335 = vperm.xlu1 %714, %v646_v9   ;;  %300 = vperm.xlu0 %713, %v645_v10  }
  0x29   : > { %375 = vperm.xlu1 %714, %v648_v11   ;;  %340 = vperm.xlu0 %713, %v647_v12   ;;  %v465_v12 = vsub.s32 2, %v919_v22 }
  0x2d   : > { %415 = vperm.xlu1 %714, %v650_v13   ;;  %380 = vperm.xlu0 %713, %v649_v14  }
  0x31   : > { %455 = vperm.xlu1 %714, %v652_v15   ;;  %420 = vperm.xlu0 %713, %v651_v16   ;;  %v466_v15 = vrot.slane %v926_v25, %v465_v12 }
  0x35   : > { %510 = vperm.xlu1 %714, %v654_v17   ;;  %460 = vperm.xlu0 %713, %v653_v18  }
  0x39   : > { %188 = vperm.xlu1 %714, %v180_v19   ;;  %515 = vperm.xlu0 %713, %v655_v20  }
  0x90   : > { %v184_v28 = vpop.permute.xlu1 %183  ;;  %v172_v29 = vpop.permute.xlu0 %171 }
  0x91   : > { %v202_v30 = vmul.f32 %v929_v26, %v184_v28  ;;  %v203_v31 = vmul.f32 %v932_v27, %v184_v28 }
  0x93   : > { %v936_v32 = vadd.f32 %v202_v30, %v172_v29  ;;  %v938_v33 = vadd.f32 %v203_v31, %v172_v29 }
  0x94   : > { %v216_v34 = vpop.permute.xlu1 %215  ;;  %v177_v35 = vpop.permute.xlu0 %176 }
  0x95   : > { %v223_v36 = vmul.f32 %v216_v34, %v929_v26  ;;  %v224_v37 = vmul.f32 %v216_v34, %v932_v27 }
  0x97   : > { %233 = vrot.lane.b32.xlu1 %v224_v37, %s778_s6  ;;  %231 = vrot.lane.b32.xlu0 %v223_v36, %s778_s6 }
  0x98   : > { %v256_v38 = vpop.permute.xlu1 %255  ;;  %v221_v39 = vpop.permute.xlu0 %220 }
  0x99   : > { %v225_v40 = vmul.f32 %v221_v39, %v929_v26  ;;  %v226_v41 = vmul.f32 %v221_v39, %v932_v27  ;;  %v263_v43 = vmul.f32 %v256_v38, %v929_v26  ;;  %v264_v44 = vmul.f32 %v256_v38, %v932_v27 }
  0x9b   : > { %237 = vrot.lane.b32.xlu1 %v226_v41, %s778_s6  ;;  %235 = vrot.lane.b32.xlu0 %v225_v40, %s778_s6  ;;  %s719_s6 = sshll.u32 %s786_s5, 4  ;;  %s720_s6 = int_to_ptr.vmem [resolvable:$false] %s719_s6 }
  0x9c   : > { %v296_v42 = vpop.permute.xlu1 %295  ;;  %v261_v45 = vpop.permute.xlu0 %260  ;;  %p722_p0 = scmp.lt.s32.totalorder %s1011_s26, %s720_s6 }
  0x9d   : > { %v265_v47 = vmul.f32 %v261_v45, %v929_v26  ;;  %v266_v48 = vmul.f32 %v261_v45, %v932_v27  ;;  %v303_v50 = vmul.f32 %v296_v42, %v929_v26  ;;  %v304_v51 = vmul.f32 %v296_v42, %v932_v27 }
  0x9f   : > { %273 = vrot.lane.b32.xlu1 %v264_v44, %s779_s7  ;;  %271 = vrot.lane.b32.xlu0 %v263_v43, %s779_s7 }
  0xa0   : > { %v336_v46 = vpop.permute.xlu1 %335  ;;  %v301_v52 = vpop.permute.xlu0 %300 }
  0xa1   : > { %v305_v54 = vmul.f32 %v301_v52, %v929_v26  ;;  %v306_v55 = vmul.f32 %v301_v52, %v932_v27  ;;  %v343_v57 = vmul.f32 %v336_v46, %v929_v26  ;;  %v344_v58 = vmul.f32 %v336_v46, %v932_v27 }
  0xa3   : > { %277 = vrot.lane.b32.xlu1 %v266_v48, %s779_s7  ;;  %275 = vrot.lane.b32.xlu0 %v265_v47, %s779_s7  ;;  %s721_s7 = scalar_lea.vmem %s720_s6, 1024 }
  0xa4   : > { %v376_v49 = vpop.permute.xlu1 %375  ;;  %v341_v59 = vpop.permute.xlu0 %340  ;;  %p723_p1 = scmp.lt.s32.totalorder %s721_s7, %s715_s4 }
  0xa5   : > { %v345_v61 = vmul.f32 %v341_v59, %v929_v26  ;;  %v346_v62 = vmul.f32 %v341_v59, %v932_v27  ;;  %v383_v0 = vmul.f32 %v376_v49, %v929_v26  ;;  %v384_v1 = vmul.f32 %v376_v49, %v932_v27 }
  0xa6   : > { %p724_p2 = por %p723_p1, %p722_p0 }
  0xa7   : > { %313 = vrot.lane.b32.xlu1 %v304_v51, %s780_s8  ;;  %311 = vrot.lane.b32.xlu0 %v303_v50, %s780_s8 }
  0xa8   : > { %v416_v53 = vpop.permute.xlu1 %415  ;;  %v381_v4 = vpop.permute.xlu0 %380  ;;  %p725_p3 = pnand %p724_p2, %p718_p13 }
  0xa9   : > { %v385_v7 = vmul.f32 %v381_v4, %v929_v26  ;;  %v386_v8 = vmul.f32 %v381_v4, %v932_v27  ;;  %v423_v9 = vmul.f32 %v416_v53, %v929_v26  ;;  %v424_v10 = vmul.f32 %v416_v53, %v932_v27 }
  0xab   : > { %317 = vrot.lane.b32.xlu1 %v306_v55, %s780_s8  ;;  %315 = vrot.lane.b32.xlu0 %v305_v54, %s780_s8 }
  0xac   : > { %v456_v56 = vpop.permute.xlu1 %455  ;;  %v421_v11 = vpop.permute.xlu0 %420 }
  0xad   : > { %v425_v13 = vmul.f32 %v421_v11, %v929_v26  ;;  %v426_v14 = vmul.f32 %v421_v11, %v932_v27  ;;  %v468_v16 = vmul.f32 %v456_v56, %v929_v26  ;;  %v469_v17 = vmul.f32 %v456_v56, %v932_v27 }
  0xae   : > { %v470_v19 = vmul.f32 %v466_v15, %v456_v56 }
  0xaf   : > { %353 = vrot.lane.b32.xlu1 %v344_v58, %s781_s9  ;;  %351 = vrot.lane.b32.xlu0 %v343_v57, %s781_s9 }
  0xb0   : > { %v511_v60 = vpop.permute.xlu1 %510  ;;  %v461_v18 = vpop.permute.xlu0 %460 }
  0xb1   : > { %v471_v20 = vmul.f32 %v461_v18, %v929_v26  ;;  %v472_v21 = vmul.f32 %v461_v18, %v932_v27  ;;  %v473_v22 = vmul.f32 %v466_v15, %v461_v18  ;;  %v518_v23 = vmul.f32 %v511_v60, %v929_v26 }
  0xb2   : > { %v519_v24 = vmul.f32 %v511_v60, %v932_v27  ;;  %v520_v28 = vmul.f32 %v511_v60, %v466_v15 }
  0xb3   : > { %357 = vrot.lane.b32.xlu1 %v346_v62, %s781_s9  ;;  %355 = vrot.lane.b32.xlu0 %v345_v61, %s781_s9 }
  0xb4   : > { %v189_v63 = vpop.permute.xlu1 %188  ;;  %v516_v25 = vpop.permute.xlu0 %515 }
  0xb5   : > { %v204_v2 = vmul.f32 %v929_v26, %v189_v63  ;;  %v205_v3 = vmul.f32 %v932_v27, %v189_v63  ;;  %v521_v29 = vmul.f32 %v516_v25, %v929_v26  ;;  %v522_v30 = vmul.f32 %v516_v25, %v932_v27 }
  0xb6   : > { %v523_v31 = vmul.f32 %v516_v25, %v466_v15 }
  0xb7   : > { %v960_v5 = vadd.f32 %v204_v2, %v177_v35  ;;  %393 = vrot.lane.b32.xlu1 %v384_v1, %s782_s10  ;;  %391 = vrot.lane.b32.xlu0 %v383_v0, %s782_s10  ;;  %v962_v6 = vadd.f32 %v205_v3, %v177_v35 }
  0xbb   : > { %397 = vrot.lane.b32.xlu1 %v386_v8, %s782_s10  ;;  %395 = vrot.lane.b32.xlu0 %v385_v7, %s782_s10 }
  0xbf   : > { %433 = vrot.lane.b32.xlu1 %v424_v10, %s783_s11  ;;  %431 = vrot.lane.b32.xlu0 %v423_v9, %s783_s11 }
  0xc3   : > { %437 = vrot.lane.b32.xlu1 %v426_v14, %s783_s11  ;;  %435 = vrot.lane.b32.xlu0 %v425_v13, %s783_s11 }
  0xc7   : > { %482 = vrot.lane.b32.xlu1 %v469_v17, %s784_s17  ;;  %480 = vrot.lane.b32.xlu0 %v468_v16, %s784_s17 }
  0xcb   : > { %486 = vrot.lane.b32.xlu1 %v471_v20, %s784_s17  ;;  %484 = vrot.lane.b32.xlu0 %v470_v19, %s784_s17 }
  0xcf   : > { %490 = vrot.lane.b32.xlu1 %v473_v22, %s784_s17  ;;  %488 = vrot.lane.b32.xlu0 %v472_v21, %s784_s17 }
  0xd3   : > { %532 = vrot.lane.b32.xlu1 %v519_v24, %s785_s19  ;;  %530 = vrot.lane.b32.xlu0 %v518_v23, %s785_s19 }
  0xd7   : > { %536 = vrot.lane.b32.xlu1 %v521_v29, %s785_s19  ;;  %534 = vrot.lane.b32.xlu0 %v520_v28, %s785_s19 }
  0xdb   : > { %540 = vrot.lane.b32.xlu1 %v523_v31, %s785_s19  ;;  %538 = vrot.lane.b32.xlu0 %v522_v30, %s785_s19 }
 0x109   : > { %v234_v34 = vpop.permute.xlu1 %233  ;;  %v232_v35 = vpop.permute.xlu0 %231 }
 0x10a   : > { %v240_v56 = vsel %vm239_vm0, %v232_v35, %v234_v34  ;;  %v247_v0 = vadd.f32 %v234_v34, %v938_v33 }
 0x10b   : > { %v246_v58 = vadd.f32 %v240_v56, %v936_v32 }
 0x10d   : > { %v238_v36 = vpop.permute.xlu1 %237  ;;  %v236_v37 = vpop.permute.xlu0 %235 }
 0x10e   : > { %v241_v4 = vsel %vm239_vm0, %v236_v37, %v238_v36  ;;  %v249_v11 = vadd.f32 %v238_v36, %v962_v6 }
 0x10f   : > { %v248_v33 = vadd.f32 %v241_v4, %v960_v5 }
 0x111   : > { %v274_v38 = vpop.permute.xlu1 %273  ;;  %v272_v39 = vpop.permute.xlu0 %271 }
 0x112   : > { %v280_v57 = vsel %vm279_vm1, %v272_v39, %v274_v38  ;;  %v287_v7 = vadd.f32 %v274_v38, %v247_v0 }
 0x113   : > { %v286_v62 = vadd.f32 %v280_v57, %v246_v58 }
 0x115   : > { %v278_v40 = vpop.permute.xlu1 %277  ;;  %v276_v41 = vpop.permute.xlu0 %275 }
 0x116   : > { %v281_v9 = vsel %vm279_vm1, %v276_v41, %v278_v40  ;;  %v289_v18 = vadd.f32 %v278_v40, %v249_v11 }
 0x117   : > { %v288_v19 = vadd.f32 %v281_v9, %v248_v33 }
 0x119   : > { %v314_v42 = vpop.permute.xlu1 %313  ;;  %v312_v43 = vpop.permute.xlu0 %311 }
 0x11a   : > { %v320_v61 = vsel %vm319_vm2, %v312_v43, %v314_v42  ;;  %v327_v12 = vadd.f32 %v314_v42, %v287_v7 }
 0x11b   : > { %v326_v1 = vadd.f32 %v320_v61, %v286_v62 }
 0x11d   : > { %v318_v44 = vpop.permute.xlu1 %317  ;;  %v316_v45 = vpop.permute.xlu0 %315 }
 0x11e   : > { %v321_v16 = vsel %vm319_vm2, %v316_v45, %v318_v44  ;;  %v329_v6 = vadd.f32 %v318_v44, %v289_v18 }
 0x11f   : > { %v328_v23 = vadd.f32 %v321_v16, %v288_v19 }
 0x121   : > { %v354_v26 = vpop.permute.xlu1 %353  ;;  %v352_v46 = vpop.permute.xlu0 %351 }
 0x122   : > { %v360_v63 = vsel %vm359_vm3, %v352_v46, %v354_v26  ;;  %v367_v20 = vadd.f32 %v354_v26, %v327_v12 }
 0x123   : > { %v366_v8 = vadd.f32 %v360_v63, %v326_v1 }
 0x125   : > { %v358_v47 = vpop.permute.xlu1 %357  ;;  %v356_v48 = vpop.permute.xlu0 %355 }
 0x126   : > { %v361_v22 = vsel %vm359_vm3, %v356_v48, %v358_v47  ;;  %v369_v34 = vadd.f32 %v358_v47, %v329_v6 }
 0x127   : > { %v368_v35 = vadd.f32 %v361_v22, %v328_v23 }
 0x129   : > { %v394_v27 = vpop.permute.xlu1 %393  ;;  %v392_v49 = vpop.permute.xlu0 %391 }
 0x12a   : > { %v400_v32 = vsel %vm399_vm4, %v392_v49, %v394_v27  ;;  %v407_v5 = vadd.f32 %v394_v27, %v367_v20 }
 0x12b   : > { %v406_v13 = vadd.f32 %v400_v32, %v366_v8 }
 0x12d   : > { %v398_v50 = vpop.permute.xlu1 %397  ;;  %v396_v51 = vpop.permute.xlu0 %395 }
 0x12e   : > { %v401_v29 = vsel %vm399_vm4, %v396_v51, %v398_v50  ;;  %v409_v39 = vadd.f32 %v398_v50, %v369_v34 }
 0x12f   : > { %v408_v40 = vadd.f32 %v401_v29, %v368_v35 }
 0x131   : > { %v434_v52 = vpop.permute.xlu1 %433  ;;  %v432_v53 = vpop.permute.xlu0 %431 }
 0x132   : > { %v440_v10 = vsel %vm439_vm5, %v432_v53, %v434_v52  ;;  %v447_v36 = vadd.f32 %v434_v52, %v407_v5 }
 0x133   : > { %v446_v21 = vadd.f32 %v440_v10, %v406_v13 }
 0x135   : > { %v980_v54 = vpop.permute.xlu1 %437  ;;  %v436_v55 = vpop.permute.xlu0 %435 }
 0x136   : > { %v441_v38 = vsel %vm439_vm5, %v436_v55, %v980_v54  ;;  %v449_v46 = vadd.f32 %v980_v54, %v409_v39 }
 0x137   : > { %v448_v47 = vadd.f32 %v441_v38, %v408_v40 }
 0x139   : > { %v483_v59 = vpop.permute.xlu1 %482  ;;  %v481_v60 = vpop.permute.xlu0 %480 }
 0x13a   : > { %v493_v17 = vsel %vm492_vm6, %v481_v60, %v483_v59 }
 0x13b   : > { %v501_v24 = vadd.f32 %v493_v17, %v446_v21 }
 0x13d   : > { %v487_v2 = vpop.permute.xlu1 %486  ;;  %v485_v3 = vpop.permute.xlu0 %484 }
 0x13e   : > { %v494_v30 = vsel %vm492_vm6, %v483_v59, %v485_v3 }
 0x13f   : > { %v502_v41 = vadd.f32 %v494_v30, %v447_v36 }
 0x141   : > { %v491_v14 = vpop.permute.xlu1 %490  ;;  %v489_v15 = vpop.permute.xlu0 %488 }
 0x142   : > { %v495_v44 = vsel %vm492_vm6, %v487_v2, %v489_v15  ;;  %v496_v45 = vsel %vm492_vm6, %v489_v15, %v491_v14 }
 0x143   : > { %v503_v27 = vadd.f32 %v495_v44, %v448_v47  ;;  %v504_v49 = vadd.f32 %v496_v45, %v449_v46 }
 0x145   : > { %v533_v25 = vpop.permute.xlu1 %532  ;;  %v531_v28 = vpop.permute.xlu0 %530 }
 0x146   : > { %v543_v31 = vsel %vm542_vm7, %v531_v28, %v533_v25 }
 0x147   : > { %v551_v37 = vadd.f32 %v543_v31, %v501_v24 }
 0x149   : > { %555 = vst [vmem:[%s161_s25] sm:$0xff] %v551_v37  ;;  %v537_v42 = vpop.permute.xlu1 %536  ;;  %v535_v43 = vpop.permute.xlu0 %534 }
 0x14a   : > { %v544_v26 = vsel %vm542_vm7, %v533_v25, %v535_v43 }
 0x14b   : > { %v552_v48 = vadd.f32 %v544_v26, %v502_v41 }
 0x14d   : > { %556 = vst.msk [vmem:[%s161_s25 + $0x8] sm:$0xff] %vm439_vm5, %v552_v48  ;;  %v541_v50 = vpop.permute.xlu1 %540  ;;  %v539_v51 = vpop.permute.xlu0 %538 }
 0x14e   : > { %v545_v52 = vsel %vm542_vm7, %v537_v42, %v539_v51  ;;  %v546_v53 = vsel %vm542_vm7, %v539_v51, %v541_v50 }
 0x14f   : > { %v553_v54 = vadd.f32 %v545_v52, %v503_v27  ;;  %v554_v55 = vadd.f32 %v546_v53, %v504_v49 }
 0x151   : > { %557 = vst [vmem:[%s161_s25 + $0x10] sm:$0xff] %v553_v54  ;;  %558 = vst.msk [vmem:[%s161_s25 + $0x18] sm:$0xff] %vm439_vm5, %v554_v55 }
 0x152   : > { %728 = shalt.err (!%p725_p3)
}
 0x153   : > { %s729_s8 = scalar_lea.hbm %s1018_s29, 512  ;;  %s733_s11 = scalar_lea.hbm %s1066_s3, 1024 }
 0x154   : > { %p730_p4 = scmp.ne.s32.totalorder %s1018_s29, %s729_s8  ;;  %p734_p9 = scmp.lt.s32.totalorder %s1018_s29, %s1066_s3 }
 0x155   : > { %p735_p10 = scmp.lt.s32.totalorder %s733_s11, %s729_s8 }
 0x156   : > { %p731_p7 = pnand %p730_p4, %p847_p5 }
 0x157   : > { %p736_p11 = por %p735_p10, %p734_p9 }
 0x158   : > { %p732_p8 = pneg %p731_p7 }
 0x15a   : > { %p737_p12 = pnand %p736_p11, %p732_p8 }
 0x15c   : > { %740 = shalt.err (!%p737_p12)
}
 0x15d   : > { %s787_s20 = smov 256   ;;  %s788_s24 = smov 16  }
 0x15e   : > { %663 = dma.vmem_to_hbm [thread:$0]  (%p847_p5), %s1011_s26, 512, %s1018_s29, %s1023_s30, %s787_s20, %s787_s20, %s788_s24  }
 0x15f PF: > { %p669_p13 = scmp.ge.s32.totalorder %s775_s15, 2  ;;  %s588_s25 = sand.u32 1, %s763_s12  }
 0x160   : > { %s589_s27 = scalar_lea.sflag [#allocation3], %s588_s25 }
 0x161   : > { %p666_p0 = pnand %p669_p13, %p851_p6 }
 0x163   : > { %p667_p1 = pneg %p666_p0 }
 0x165   : > { %758 = dma.done.wait (%p667_p1), %s589_s27, 512  }
 0x166   : > { %760 = vsyncadd (%p667_p1), %s589_s27, 4294966784  ;;  %p13_p2 = scmp.ge.s32.totalorder %s834_s18, 4   ;;  %s1069_s12 = smov %s767_s13 }
 0x167   : > { %s1070_s13 = smov %s771_s14  ;;  %s1071_s14 = smov %s845_s21 }
 0x168   : > { %s1072_s15 = smov %s834_s18  ;;  %15 = sbr.rel (!%p13_p2) target bundleno = 3 (0x3), region = 75 }
 0x16d   :  { %594 = vsyncpa [#allocation3], 1 }
 0x16e   :  { %596 = vsyncpa [#allocation3 + $0x1], 1 }

</bundles_post_ra>
